<compile_context>
chip_gen: v6e
topology: v6e:2x2x1
jax: 0.10.0
libtpu: 0.0.40
codegen_flags: <defaults>
</compile_context>

<pallas_src>
import numpy as np
import jax
import jax.numpy as jnp
from jax.experimental import pallas as pl
from jax.experimental.pallas import tpu as pltpu


_PALLAS_MIN_BYTES = 256 * 1024       # below this, XLA's gather is strictly faster
_PER_BUFFER_BYTES = 4 * 1024 * 1024  # per-pipeline-buffer VMEM budget


def _subsample_indices(t: int, num_samples: int) -> np.ndarray:
    """Equispaced temporal indices matching pytorchvideo:
    torch.linspace(0, t-1, N) (float32 default dtype) -> clamp -> .long().
    Computed on host; truncation toward zero == floor for non-negative values."""
    idx = np.linspace(0.0, float(t - 1), num_samples, dtype=np.float32)
    idx = np.clip(idx, 0, t - 1)
    return idx.astype(np.int32)


def _copy_kernel(idx_ref, x_ref, o_ref):
    # The temporal gather is expressed in the input BlockSpec index_map via
    # the scalar-prefetched SMEM indices; the body is a straight copy of a
    # lane-dense (tc, Rt, 128) tile.
    del idx_ref
    o_ref[...] = x_ref[...]


def _vmem_hard_cap() -> int:
    """Per-generation VMEM cap: ~75% of physical (48 MiB on v7x's 64 MiB,
    96 MiB on 128 MiB chips), conservative fallback if the query fails."""
    try:
        cap = int(pltpu.get_tpu_info().vmem_capacity_bytes)
    except Exception:
        cap = 64 << 20  # assume smallest (v7x per-TC VMEM)
    return min(cap * 3 // 4, 100 << 20)


def uniform_temporal_subsample(x: jax.Array, num_samples: int,
                               temporal_dim: int = -3) -> jax.Array:
    assert temporal_dim in (-3, x.ndim - 3), "kernel assumes temporal dim is -3"
    C, T, H, W = x.shape
    indices = _subsample_indices(T, num_samples)
    idx_dev = jnp.asarray(indices)

    # Tiny inputs: kernel launch + grid-step overhead dominates; use XLA gather.
    if x.size * x.dtype.itemsize < _PALLAS_MIN_BYTES:
        return jnp.take(x, idx_dev, axis=1)

    hw = H * W
    if hw % 128 != 0:
        # TODO(synk): pad->kernel->slice lane-dense Pallas path for large
        # non-%128 frames; XLA's gather is bandwidth-bound here and avoids
        # sublane-sparse tiles / masked vst.msk partial stores.
        return jnp.take(x, idx_dev, axis=1)

    # Lane-dense trailing dims: spatial extent mapped onto full 128-lane rows.
    R, L = hw // 128, 128
    xr = x.reshape(C, T, R, L)
    itemsize = x.dtype.itemsize
    per_channel = R * L * itemsize

    # Tile channels (and spatial rows for large frames) so each pipeline
    # buffer stays within budget regardless of frame size.
    if per_channel <= _PER_BUFFER_BYTES:
        Rt = R
        tc = int(max(1, min(C, _PER_BUFFER_BYTES // per_channel)))
        if C >= 2:
            # Keep >= 2 channel blocks so the leading parallel axis splits
            # evenly across v7x's 2 TensorCores.
            tc = min(tc, -(-C // 2))
    else:
        tc = 1
        rows_budget = _PER_BUFFER_BYTES // (L * itemsize)
        Rt = int(min(R, max(8, (rows_budget // 8) * 8)))  # multiple of 8 (sublane rule)

    num_c_blocks = pl.cdiv(C, tc)
    num_r_blocks = pl.cdiv(R, Rt)
    block_bytes = tc * Rt * L * itemsize
    vmem_limit = int(min(max(6 * block_bytes + (1 << 20), 32 << 20), _vmem_hard_cap()))

    grid_spec = pltpu.PrefetchScalarGridSpec(
        num_scalar_prefetch=1,
        # Channel outer, samples INNERMOST: consecutive duplicate temporal
        # indices reuse the same input block (DMA skipped) and output frames
        # are written contiguously per channel block.
        grid=(num_c_blocks, num_r_blocks, num_samples),
        in_specs=[
            pl.BlockSpec(
                (tc, pl.Squeezed(), Rt, L),
                # Gather: block index along T comes from prefetched indices.
                lambda c, r, i, idx_ref: (c, idx_ref[i], r, 0),
            ),
        ],
        out_specs=pl.BlockSpec(
            (tc, pl.Squeezed(), Rt, L),
            lambda c, r, i, idx_ref: (c, i, r, 0),
        ),
    )

    out = pl.pallas_call(
        _copy_kernel,
        out_shape=jax.ShapeDtypeStruct((C, num_samples, R, L), x.dtype),
        grid_spec=grid_spec,
        compiler_params=pltpu.CompilerParams(
            # Every grid step writes a disjoint output block and only reads
            # the input -> all axes safe to shard across TensorCores.
            dimension_semantics=("parallel", "parallel", "parallel"),
            vmem_limit_bytes=vmem_limit,
        ),
    )(idx_dev, xr)

    return out.reshape(C, num_samples, H, W)


class UniformTemporalSubsample:
    """JAX/Pallas equivalent of the PyTorch nn.Module wrapper."""

    def __init__(self, num_samples: int, temporal_dim: int = -3):
        self._num_samples = num_samples
        self._temporal_dim = temporal_dim

    def __call__(self, x: jax.Array) -> jax.Array:
        return uniform_temporal_subsample(x, self._num_samples, self._temporal_dim)


if __name__ == "__main__":
    key = jax.random.PRNGKey(0)

    # Main Pallas path: hw = 32*64 = 2048 -> lane-dense (16, 128) rows,
    # 384 KiB total (> bypass threshold); C=3 exercises a partial channel block.
    C, T, H, W = 3, 16, 32, 64
    num_samples = 5
    x = jax.random.normal(key, (C, T, H, W), dtype=jnp.float32)
    module = UniformTemporalSubsample(num_samples=num_samples, temporal_dim=-3)
    out = jax.block_until_ready(module(x))
    ref = jnp.take(x, jnp.asarray(_subsample_indices(T, num_samples)), axis=1)
    assert out.shape == (C, num_samples, H, W)
    assert jnp.array_equal(out, ref)

    # Duplicate-index regime (num_samples > T): exercises input-DMA dedup with
    # samples as the innermost grid axis. 512 KiB -> Pallas path.
    x2 = jax.random.normal(jax.random.PRNGKey(1), (4, 4, 64, 128), jnp.float32)
    out2 = jax.block_until_ready(UniformTemporalSubsample(num_samples=7)(x2))
    ref2 = jnp.take(x2, jnp.asarray(_subsample_indices(4, 7)), axis=1)
    assert jnp.array_equal(out2, ref2)

    # Tiny / non-lane-dense input routes to the XLA gather fallback.
    x3 = jax.random.normal(jax.random.PRNGKey(2), (3, 8, 14, 14), jnp.float32)
    out3 = jax.block_until_ready(UniformTemporalSubsample(num_samples=3)(x3))
    ref3 = jnp.take(x3, jnp.asarray(_subsample_indices(8, 3)), axis=1)
    assert jnp.array_equal(out3, ref3)

    print("KERNEL_OK")
</pallas_src>

<mosaic_0001>
module attributes {stable_mosaic.version = 11 : i64} {
  func.func @_copy_kernel(%arg0: i32, %arg1: i32, %arg2: i32, %arg3: memref<5xi32, #tpu.memory_space<smem>>, %arg4: memref<2x1x16x128xf32, #tpu.memory_space<vmem>>, %arg5: memref<2x1x16x128xf32, #tpu.memory_space<vmem>>) attributes {dimension_semantics = [#tpu.dimension_semantics<parallel>, #tpu.dimension_semantics<parallel>, #tpu.dimension_semantics<parallel>], iteration_bounds = array<i64: 2, 1, 5>, scalar_prefetch = 1 : i64, scratch_operands = 0 : i64, tpu.core_type = #tpu.core_type<tc>, window_params = [{transform_indices = @transform_0, window_bounds = array<i64: 2, 1, 16, 128>}, {transform_indices = @transform_1, window_bounds = array<i64: 2, 1, 16, 128>}]} {
    %c0 = arith.constant 0 : index
    %c0_0 = arith.constant 0 : index
    %c0_1 = arith.constant 0 : index
    %c0_2 = arith.constant 0 : index
    %0 = vector.load %arg4[%c0, %c0_0, %c0_1, %c0_2] : memref<2x1x16x128xf32, #tpu.memory_space<vmem>>, vector<2x1x16x128xf32>
    %1 = vector.shape_cast %0 : vector<2x1x16x128xf32> to vector<2x16x128xf32>
    %c0_3 = arith.constant 0 : index
    %c0_4 = arith.constant 0 : index
    %c0_5 = arith.constant 0 : index
    %c0_6 = arith.constant 0 : index
    %2 = vector.load %arg5[%c0_3, %c0_4, %c0_5, %c0_6] : memref<2x1x16x128xf32, #tpu.memory_space<vmem>>, vector<2x1x16x128xf32>
    %3 = vector.shape_cast %2 : vector<2x1x16x128xf32> to vector<2x16x128xf32>
    %4 = vector.shape_cast %1 : vector<2x16x128xf32> to vector<2x1x16x128xf32>
    tpu.vector_store %arg5[%c0_3, %c0_4, %c0_5, %c0_6], %4 {strides = array<i32>} : memref<2x1x16x128xf32, #tpu.memory_space<vmem>>, vector<2x1x16x128xf32>,
    return
  }
  func.func @transform_0(%arg0: i32, %arg1: i32, %arg2: i32, %arg3: memref<5xi32, #tpu.memory_space<smem>>) -> (i32, i32, i32, i32) {
    %0 = arith.index_cast %arg2 : i32 to index
    %1 = memref.load %arg3[%0] : memref<5xi32, #tpu.memory_space<smem>>
    %c0_i32 = arith.constant 0 : i32
    %c0_i32_0 = arith.constant 0 : i32
    return %arg0, %1, %arg1, %c0_i32 : i32, i32, i32, i32
  }
  func.func @transform_1(%arg0: i32, %arg1: i32, %arg2: i32, %arg3: memref<5xi32, #tpu.memory_space<smem>>) -> (i32, i32, i32, i32) {
    %c0_i32 = arith.constant 0 : i32
    %c0_i32_0 = arith.constant 0 : i32
    return %arg0, %arg2, %arg1, %c0_i32 : i32, i32, i32, i32
  }
}

</mosaic_0001>

<bundles_post_ra>
// kernel: tpu_custom_call.1
= control target key start
LH: loop header
LB: loop body
LE: loop exit
PB: predicated region body
PF: predicated region fallthrough
CT: control target
= control target key end

     0   :  { %s626_s9 = smov [#allocation3]   ;;  %s843_s0 = inlined_call_operand.hbm [shape: s32[5], index: 0, kind: input, shape index: {}]   ;;  %s844_s1 = inlined_call_operand.hbm [shape: f32[3,16,16,128], index: 1, kind: input, shape index: {}]   ;;  %s845_s2 = inlined_call_operand.hbm [shape: f32[3,5,16,128], index: 2, kind: output, shape index: {}]  }
   0x1   :  { %8 = dma.hbm_to_smem %s843_s0, 16, %s626_s9, [#allocation2] }
   0x2   :  { %572 = dma.done.wait [#allocation2], 16 }
   0x3   :  { %573 = vsyncadd [#allocation2], 4294967280 }
   0x4   :  { %10 = sfence }
   0x5   :  { %11 = vsyncpa [#allocation5], 0 }
   0x6   :  { %13 = vsyncpa [#allocation5 + $0x1], 0 }
   0x7   :  { %14 = vsyncpa [#allocation6], 0 }
   0x8   :  { %16 = vsyncpa [#allocation6 + $0x1], 0  ;;  %s658_s12 = smov 0   ;;  %s660_s13 = smov 0  }
   0x9   :  { %s662_s14 = smov 0   ;;  %s664_s15 = smov 0  }
   0xa   :  { %s666_s16 = smov 0   ;;  %s668_s17 = smov 0  }
   0xb   :  { %s670_s0 = smov 0   ;;  %s672_s18 = smov 0  }
   0xc   :  { %s674_s19 = smov 0   ;;  %s676_s20 = smov 0  }
   0xd   :  { %s678_s21 = smov 0  }
   0xe LB: > { %851 = sst [smem:[#allocation15_spill]] %s604_s17  ;;  %s376_s22 = sadd.s32 4294967295, %s624_s21   ;;  %s624_s21 = sphi %s678_s21, %s22_s21   ;;  %s620_s20 = sphi %s676_s20, %s866_s20   ;;  %s616_s19 = sphi %s674_s19, %s865_s19   ;;  %s612_s18 = sphi %s672_s18, %s864_s18   ;;  %s608_s0 = sphi %s670_s0, %s863_s0   ;;  %s604_s17 = sphi %s668_s17, %s862_s17   ;;  %s600_s16 = sphi %s666_s16, %s871_s16   ;;  %s596_s15 = sphi %s664_s15, %s870_s15   ;;  %s592_s14 = sphi %s662_s14, %s869_s14   ;;  %s588_s13 = sphi %s660_s13, %s868_s13   ;;  %s584_s12 = sphi %s658_s12, %s867_s12  }
   0xf   : > { %852 = sst [smem:[#allocation16_spill]] %s616_s19  ;;  %s377_s23 = sadd.s32 4294967294, %s624_s21  }
  0x10   : > { %853 = sst [smem:[#allocation17_spill]] %s620_s20  ;;  %s34_s24 = sadd.s32 1, %s616_s19 }
  0x11   : > { %s41_s25 = sadd.s32 1, %s620_s20  ;;  %p35_p0 = scmp.ge.s32.totalorder %s34_s24, 5 }
  0x12   : > { %s45_s26 = sld [smem:[#allocation3 + %s616_s19]]  ;;  %s54_s27 = sadd.s32 1, %s604_s17 }
  0x13   : > { %p61_p1 = scmp.ne.s32.totalorder %s604_s17, %s600_s16  ;;  %s873_s24 = smov (%p35_p0, %s34_s24), 0 }
  0x14   : > { %854 = sst [smem:[#allocation18_spill]] %s873_s24  ;;  %s875_s25 = smov (!%p35_p0, %s41_s25), %s620_s20 }
  0x15   : > { %s46_s28 = sld [smem:[#allocation3 + %s873_s24]]  ;;  %p62_p2 = scmp.eq.s32.totalorder %s624_s21, 0 }
  0x16   : > { %p43_p3 = scmp.ge.s32.totalorder %s875_s25, 2  ;;  %p67_p4 = scmp.ne.s32.totalorder %s600_s16, %s596_s15 }
  0x17   : > { %p725_p5 = por %p62_p2, %p61_p1  ;;  %p68_p6 = scmp.eq.s32.totalorder %s376_s22, 0 }
  0x18   : > { %s877_s25 = smov (%p43_p3, %s875_s25), 0  ;;  %s78_s3 = ssub.s32 %s616_s19, %s873_s24 }
  0x19   : > { %856 = sst [smem:[#allocation19_spill]] %s877_s25  ;;  %p733_p7 = por %p68_p6, %p67_p4 }
  0x1a   : > { %s47_s4 = ssub.s32 %s620_s20, %s877_s25  ;;  %s84_s5 = sadd.s32 1, %s592_s14 }
  0x1b   : > { %s48_s6 = ssub.s32 %s45_s26, %s46_s28  ;;  %s79_s7 = sor.u32 %s78_s3, %s47_s4 }
  0x1c   : > { %s49_s8 = sor.u32 %s48_s6, %s47_s4  ;;  %p82_p8 = scmp.eq.s32.totalorder %s79_s7, 0 }
  0x1d   : > { %p52_p9 = scmp.eq.s32.totalorder %s49_s8, 0  ;;  %p94_p10 = scmp.ne.s32.totalorder %s592_s14, %s588_s13 }
  0x1e   : > { %s745_s9 = scalar_select %p82_p8, %s592_s14, %s84_s5  }
  0x1f   : > { %s748_s10 = scalar_select %p52_p9, %s604_s17, %s54_s27  }
  0x20   : > { %p95_p11 = scmp.eq.s32.totalorder %s376_s22, 9  ;;  %p100_p12 = scmp.ne.s32.totalorder %s588_s13, %s584_s12 }
  0x21   : > { %858 = sst [smem:[#allocation20_spill]] %s748_s10  ;;  %p101_p13 = scmp.eq.s32.totalorder %s377_s23, 9 }
  0x22   : > { %p756_p0 = por %p95_p11, %p94_p10  ;;  %p379_p2 = scmp.ge.s32.totalorder %s624_s21, 10 }
  0x23   : > { %p760_p1 = por %p101_p13, %p100_p12 }
  0x24   : > { %117 = sbr.rel (%p379_p2) target bundleno = 66 (0x42), region = 16 }
  0x29   : > { %120 = sbr.rel (!%p725_p5) target bundleno = 66 (0x42), region = 20 }
  0x2e   : > { %s121_s22 = sand.u32 1, %s604_s17   ;;  %s126_s26 = sld [smem:[#allocation3 + %s616_s19]] }
  0x2f   : > { %s380_s23 = sshll.u32 %s121_s22, 5  ;;  %s381_s27 = sshll.u32 %s620_s20, 1 }
  0x30   : > { %s129_s28 = ssub.s32 3, %s381_s27  ;;  %s773_s5 = scalar_lea.sflag [#allocation5], %s121_s22 }
  0x31   : > { %p130_p3 = scmp.lt.s32.totalorder %s129_s28, 2  ;;  %s125_s6 = scalar_lea.vmem [#allocation4], %s380_s23 }
  0x33   : > { %s879_s28 = smov (!%p130_p3, %s129_s28), 2 }
  0x34   : > { %s770_s3 = sshll.u32 %s879_s28, 8 }
  0x35   : > { %s135_s4 = ssub.s32 512, %s770_s3 }
  0x36   : > { %136 = vsyncadd %s773_s5, %s135_s4  ;;  %p384_p4 = scmp.ne.s32.totalorder %s770_s3, 0  ;;  %s385_s29 = sshll.u32 %s126_s26, 1 }
  0x37   : > { %s408_s7 = sshll.u32 %s620_s20, 6  ;;  %s149_s8 = sld [smem:[#allocation0]]  }
  0x38   : > { %s141_s25 = sadd.s32 %s408_s7, %s385_s29  ;;  %s157_s24 = sshll.u32 %s125_s6, 4  ;;  %s158_s24 = int_to_ptr.vmem [resolvable:$true] %s157_s24 }
  0x39   : > { %s387_s27 = sshll.u32 %s141_s25, 7  ;;  %s627_s10 = smov 4096  }
  0x3a   : > { %s143_s22 = scalar_lea.hbm %s844_s1, %s387_s27  ;;  %164 = sst [smem:[#allocation9]] %s627_s10 }
  0x3b   : > { %s628_s23 = smov 256   ;;  %s629_s17 = smov 2  }
  0x3c   : > { %166 = sst [smem:[#allocation9 + $0x1]] %s628_s23  ;;  %s630_s20 = smov 128  }
  0x3d   : > { %s389_s4 = sshll.u32 %s149_s8, 26  ;;  %168 = sst [smem:[#allocation9 + $0x2]] %s629_s17 }
  0x3e   : > { %s390_s26 = sadd.s32 134217728, %s389_s4  ;;  %170 = sst [smem:[#allocation9 + $0x3]] %s630_s20 }
  0x3f   : > { %172 = sst [smem:[#allocation9 + $0x4]] %s630_s20  ;;  %s631_s25 = smov 8  }
  0x40   : > { %174 = sst [smem:[#allocation9 + $0x5]] %s631_s25  ;;  %s632_s6 = smov 131072  }
  0x41   : > { %176 = dma.general (%p384_p4), %s143_s22, %s770_s3, %s158_s24, %s773_s5, %s632_s6, [#allocation9], %s390_s26, 0  }
  0x42 PF: > { %p392_p5 = scmp.ge.s32.totalorder %s624_s21, 1  ;;  %p178_p6 = scmp.lt.s32.totalorder %s624_s21, 11 }
  0x44   : > { %p179_p8 = pnand %p392_p5, %p178_p6 }
  0x45   : > { %s184_s17 = sand.u32 (!%p179_p8), 1, %s600_s16  }
  0x46   : > { %182 = sbr.rel (%p179_p8) target bundleno = 99 (0x63), region = 24  ;;  %s393_s19 = sshll.u32 (!%p179_p8), %s184_s17, 5 }
  0x47   : > { %s185_s10 = scalar_lea.sflag (!%p179_p8), [#allocation5], %s184_s17  ;;  %s188_s29 = scalar_lea.vmem (!%p179_p8), [#allocation4], %s393_s19 }
  0x4b   : > { %575 = dma.done.wait (%p733_p7), %s185_s10, 512  }
  0x4c   : > { %577 = vsyncadd (%p733_p7), %s185_s10, 4294966784  ;;  %s204_s20 = sand.u32 1, %s588_s13   ;;  %v222_v0 = vld [vmem:[%s188_s29] sm:$0xff]  ;;  %v223_v1 = vld [vmem:[%s188_s29 + $0x8] sm:$0xff]  ;;  %237 = sbr.rel (!%p756_p0) target bundleno = 99 (0x63), region = 32 }
  0x4d   : > { %s394_s24 = sshll.u32 %s204_s20, 5  ;;  %v224_v2 = vld [vmem:[%s188_s29 + $0x10] sm:$0xff]  ;;  %v225_v3 = vld [vmem:[%s188_s29 + $0x18] sm:$0xff]  ;;  %s793_s5 = scalar_lea.sflag [#allocation6], %s204_s20 }
  0x4e   : > { %s206_s3 = scalar_lea.vmem [#allocation7], %s394_s24 }
  0x4f   : > { %226 = vst [vmem:[%s206_s3] sm:$0xff] %v222_v0  ;;  %227 = vst [vmem:[%s206_s3 + $0x8] sm:$0xff] %v223_v1 }
  0x50   : > { %228 = vst [vmem:[%s206_s3 + $0x10] sm:$0xff] %v224_v2  ;;  %229 = vst [vmem:[%s206_s3 + $0x18] sm:$0xff] %v225_v3 }
  0x51   : > { %s396_s30 = sshll.u32 %s612_s18, 1 }
  0x52   : > { %s240_s7 = ssub.s32 3, %s396_s30 }
  0x53   : > { %p241_p7 = scmp.lt.s32.totalorder %s240_s7, 2 }
  0x55   : > { %s881_s7 = smov (!%p241_p7, %s240_s7), 2 }
  0x56   : > { %s409_s8 = sshll.u32 %s881_s7, 8 }
  0x57   : > { %s246_s27 = ssub.s32 512, %s409_s8 }
  0x58   : > { %247 = vsyncadd %s793_s5, %s246_s27  ;;  %p399_p9 = scmp.ne.s32.totalorder %s409_s8, 0  ;;  %s400_s28 = sshll.u32 %s608_s0, 1 }
  0x59   : > { %s410_s22 = smul.u32 20, %s612_s18  ;;  %s266_s23 = sshll.u32 %s206_s3, 4  ;;  %s267_s23 = int_to_ptr.vmem [resolvable:$true] %s266_s23 }
  0x5a   : > { %s633_s11 = smov 256   ;;  %s634_s19 = smov 1280  }
  0x5b   : > { %s252_s4 = sadd.s32 %s410_s22, %s400_s28  ;;  %273 = sst [smem:[#allocation11]] %s633_s11 }
  0x5c   : > { %s402_s26 = sshll.u32 %s252_s4, 7  ;;  %275 = sst [smem:[#allocation11 + $0x1]] %s634_s19 }
  0x5d   : > { %s254_s17 = scalar_lea.hbm %s845_s2, %s402_s26  ;;  %s635_s10 = smov 2  }
  0x5e   : > { %277 = sst [smem:[#allocation11 + $0x2]] %s635_s10  ;;  %s636_s29 = smov 128  }
  0x5f   : > { %279 = sst [smem:[#allocation11 + $0x3]] %s636_s29  ;;  %s637_s0 = smov 8  }
  0x60   : > { %281 = sst [smem:[#allocation11 + $0x4]] %s636_s29  ;;  %s638_s18 = smov 131072  }
  0x61   : > { %283 = sst [smem:[#allocation11 + $0x5]] %s637_s0  ;;  %s639_s20 = smov 0  }
  0x62   : > { %285 = dma.general (%p399_p9), %s267_s23, %s409_s8, %s254_s17, %s793_s5, %s638_s18, [#allocation11], %s639_s20, 0  }
  0x63 PF: > { %p417_p10 = scmp.ge.s32.totalorder %s624_s21, 2  ;;  %s294_s24 = sand.u32 1, %s584_s12  }
  0x64   : > { %s295_s3 = scalar_lea.sflag [#allocation6], %s294_s24 }
  0x65   : > { %p414_p11 = pnand %p417_p10, %p760_p1 }
  0x67   : > { %p415_p12 = pneg %p414_p11 }
  0x69   : > { %579 = dma.done.wait (%p415_p12), %s295_s3, 512  }
  0x6a   : > { %581 = vsyncadd (%p415_p12), %s295_s3, 4294966784  ;;  %s22_s21 = sadd.s32 1, %s624_s21   ;;  %s861_s5 = sld [smem:[#allocation15_spill]] }
  0x6b   : > { %p19_p13 = scmp.ge.s32.totalorder %s22_s21, 12   ;;  %s862_s17 = sld [smem:[#allocation20_spill]] }
  0x6c   : > { %s863_s0 = sld [smem:[#allocation16_spill]]  ;;  %s867_s12 = smov %s588_s13 }
  0x6d   : > { %s864_s18 = sld [smem:[#allocation17_spill]]  ;;  %s868_s13 = smov %s592_s14 }
  0x6e   : > { %s865_s19 = sld [smem:[#allocation18_spill]]  ;;  %s869_s14 = smov %s745_s9 }
  0x6f   : > { %s866_s20 = sld [smem:[#allocation19_spill]]  ;;  %s870_s15 = smov %s600_s16 }
  0x70   : > { %s871_s16 = smov %s861_s5  ;;  %21 = sbr.rel (!%p19_p13) target bundleno = 14 (0xe), region = 79 }
  0x75   :  { %300 = vsyncpa [#allocation5], 1 }
  0x76   :  { %302 = vsyncpa [#allocation5 + $0x1], 1 }
  0x77   :  { %303 = vsyncpa [#allocation6], 1 }
  0x78   :  { %305 = vsyncpa [#allocation6 + $0x1], 1 }

</bundles_post_ra>
